<compile_context>
chip_gen: v5e
topology: v5e:2x2
jax: 0.10.0
libtpu: 0.0.40
codegen_flags: <defaults>
</compile_context>

<pallas_src>
import functools

import jax
import jax.numpy as jnp
from jax.experimental import pallas as pl
from jax.experimental.pallas import tpu as pltpu


def _round_up(x, m):
    return (x + m - 1) // m * m


def _xw_kernel(x_ref, w_ref, xw_ref):
    # x_ref:  (TK, F_in)      bf16
    # w_ref:  (F_in, F_out_p) bf16
    # xw_ref: (TK, F_out_p)   bf16
    xw_ref[...] = jnp.dot(
        x_ref[...], w_ref[...], preferred_element_type=jnp.float32
    ).astype(xw_ref.dtype)


def _agg_kernel(adj_ref, xw_ref, b_ref, out_ref, acc_ref):
    # adj_ref: (TN, TK)       bf16  -- tile of the normalized adjacency
    # xw_ref:  (TK, F_out_p)  bf16  -- tile of the precomputed X @ W
    # b_ref:   (1, F_out_p)   f32
    # out_ref: (TN, F_out_p)  f32
    # acc_ref: (TN, F_out_p)  f32 VMEM accumulator (persists across the K axis)
    k = pl.program_id(1)

    @pl.when(k == 0)
    def _():
        acc_ref[...] = jnp.zeros_like(acc_ref)

    acc_ref[...] += jnp.dot(
        adj_ref[...], xw_ref[...], preferred_element_type=jnp.float32
    )

    @pl.when(k == pl.num_programs(1) - 1)
    def _():
        out_ref[...] = (acc_ref[...] + b_ref[...]).astype(out_ref.dtype)


@functools.partial(jax.jit, static_argnames=("tile_n", "tile_k"))
def graph_conv(adj_norm, x, kernel, bias, *, tile_n=256, tile_k=512):
    """Pallas GraphConv forward: adj_norm @ (x @ kernel) + bias (fp32 output)."""
    n, f_in = x.shape
    f_out = kernel.shape[1]
    assert adj_norm.shape == (n, n)

    compute_dtype = jnp.bfloat16

    # Lane-dense output: pad the output-feature dim to a multiple of 128 lanes.
    f_out_p = _round_up(f_out, 128)

    # Tile sizes, clamped so small problems run as a single grid step.
    # VMEM at defaults: 2*(256*512*2) + 2*(512*128*2) + 256*128*4 + 2*(256*128*4)
    # ~= 1.5 MiB -> comfortably under the 64 MiB/TC v7x budget, no explicit
    # vmem_limit_bytes needed.
    tn = min(tile_n, _round_up(n, 128))
    tk = min(tile_k, _round_up(n, 128))
    n_pad_m = _round_up(n, tn)   # padded output-row / adjacency-row dim
    n_pad_k = _round_up(n, tk)   # padded contraction (neighbor) dim

    # Zero-padding is exact: padded adjacency columns and padded XW rows are 0.
    adj_p = jnp.pad(adj_norm.astype(compute_dtype),
                    ((0, n_pad_m - n), (0, n_pad_k - n)))
    x_p = jnp.pad(x.astype(compute_dtype), ((0, n_pad_k - n), (0, 0)))
    w_p = jnp.pad(kernel.astype(compute_dtype), ((0, 0), (0, f_out_p - f_out)))
    b_p = jnp.pad(bias.astype(jnp.float32),
                  (0, f_out_p - f_out)).reshape(1, f_out_p)

    # ---- Kernel 1: XW = X @ W (row-tiled over nodes). ----
    xw = pl.pallas_call(
        _xw_kernel,
        out_shape=jax.ShapeDtypeStruct((n_pad_k, f_out_p), compute_dtype),
        grid_spec=pltpu.PrefetchScalarGridSpec(
            num_scalar_prefetch=0,
            grid=(n_pad_k // tk,),
            in_specs=[
                pl.BlockSpec((tk, f_in), lambda i: (i, 0)),        # X row tile
                pl.BlockSpec((f_in, f_out_p), lambda i: (0, 0)),   # W (small)
            ],
            out_specs=pl.BlockSpec((tk, f_out_p), lambda i: (i, 0)),
        ),
        compiler_params=pltpu.CompilerParams(
            dimension_semantics=("parallel",)),
    )(x_p, w_p)

    # ---- Kernel 2: OUT = A @ XW + b, K-tiled with fp32 accumulator. ----
    grid = (n_pad_m // tn, n_pad_k // tk)
    flops = 2 * n_pad_m * n_pad_k * f_out_p
    bytes_accessed = (n_pad_m * n_pad_k * 2      # adjacency (bf16)
                      + n_pad_k * f_out_p * 2    # XW (bf16)
                      + n_pad_m * f_out_p * 4    # output (f32)
                      + f_out_p * 4)             # bias
    out_p = pl.pallas_call(
        _agg_kernel,
        out_shape=jax.ShapeDtypeStruct((n_pad_m, f_out_p), jnp.float32),
        grid_spec=pltpu.PrefetchScalarGridSpec(
            num_scalar_prefetch=0,
            grid=grid,
            in_specs=[
                pl.BlockSpec((tn, tk), lambda i, k: (i, k)),        # A tile
                pl.BlockSpec((tk, f_out_p), lambda i, k: (k, 0)),   # XW k-tile
                pl.BlockSpec((1, f_out_p), lambda i, k: (0, 0)),    # bias
            ],
            out_specs=pl.BlockSpec((tn, f_out_p), lambda i, k: (i, 0)),
            scratch_shapes=[pltpu.VMEM((tn, f_out_p), jnp.float32)],
        ),
        compiler_params=pltpu.CompilerParams(
            dimension_semantics=("parallel", "arbitrary")),
        cost_estimate=pl.CostEstimate(
            flops=flops, transcendentals=0, bytes_accessed=bytes_accessed),
    )(adj_p, xw, b_p)

    # Slice away node / lane padding.
    return out_p[:n, :f_out]


def xavier_normal(key, shape, dtype=jnp.float32):
    fan_in, fan_out = shape
    std = (2.0 / (fan_in + fan_out)) ** 0.5
    return std * jax.random.normal(key, shape, dtype=dtype)


def normalize_adjacency(adj):
    """D^{-1/2} (A + I) D^{-1/2}  (standard GCN normalization, plain-JAX glue)."""
    n = adj.shape[0]
    a_hat = adj + jnp.eye(n, dtype=adj.dtype)
    deg = jnp.sum(a_hat, axis=1)
    d_inv_sqrt = jnp.where(deg > 0, 1.0 / jnp.sqrt(deg), 0.0)
    return a_hat * d_inv_sqrt[:, None] * d_inv_sqrt[None, :]


if __name__ == "__main__":
    # Small synthetic problem: 128 nodes, 64 input features, 32 output features.
    N_NODES, F_IN, F_OUT = 128, 64, 32

    key = jax.random.PRNGKey(0)
    k_adj, k_x, k_w = jax.random.split(key, 3)

    # Random symmetric 0/1 adjacency, then GCN-normalized (the module expects an
    # already-normalized adj_mat as input).
    rand = jax.random.uniform(k_adj, (N_NODES, N_NODES))
    adj = (rand + rand.T > 1.4).astype(jnp.float32)
    adj_norm = normalize_adjacency(adj)

    x = jax.random.normal(k_x, (N_NODES, F_IN), dtype=jnp.float32)

    # Parameters matching the module's __init__ (xavier_normal kernel, zero bias;
    # the bias=None path is numerically identical to adding zeros).
    w = xavier_normal(k_w, (F_IN, F_OUT))
    b = jnp.zeros((F_OUT,), dtype=jnp.float32)

    out = graph_conv(adj_norm, x, w, b)
    out = jax.block_until_ready(out)
    assert out.shape == (N_NODES, F_OUT)

    # Reference 1: same bf16-quantized operands, fp32 math (tight check of the
    # kernel logic itself).
    adj_q = adj_norm.astype(jnp.bfloat16).astype(jnp.float32)
    x_q = x.astype(jnp.bfloat16).astype(jnp.float32)
    w_q = w.astype(jnp.bfloat16).astype(jnp.float32)
    xw_q = (x_q @ w_q).astype(jnp.bfloat16).astype(jnp.float32)
    ref_q = adj_q @ xw_q + b[None, :]
    assert jnp.allclose(out, ref_q, atol=2e-3, rtol=2e-3), "mismatch vs bf16 ref"

    # Reference 2: full-fp32 torch semantics (loose check: error is only the
    # bf16 operand quantization, accumulation stays fp32).
    ref_f32 = adj_norm @ (x @ w) + b[None, :]
    assert jnp.allclose(out, ref_f32, atol=5e-2, rtol=5e-2), "mismatch vs fp32 ref"

    print("KERNEL_OK")
</pallas_src>

<mosaic_0001>
module attributes {stable_mosaic.version = 11 : i64} {
  func.func @_xw_kernel(%arg0: i32, %arg1: memref<128x64xbf16, #tpu.memory_space<vmem>>, %arg2: memref<64x128xbf16, #tpu.memory_space<vmem>>, %arg3: memref<128x128xbf16, #tpu.memory_space<vmem>>) attributes {dimension_semantics = [#tpu.dimension_semantics<parallel>], iteration_bounds = array<i64: 1>, scalar_prefetch = 0 : i64, scratch_operands = 0 : i64, tpu.core_type = #tpu.core_type<tc>, window_params = [{transform_indices = @transform_0, window_bounds = array<i64: 128, 64>}, {pipeline_mode = #tpu.pipeline_mode<synchronous>, transform_indices = @transform_1, window_bounds = array<i64: 64, 128>}, {transform_indices = @transform_2, window_bounds = array<i64: 128, 128>}]} {
    %c0 = arith.constant 0 : index
    %c0_0 = arith.constant 0 : index
    %0 = vector.load %arg1[%c0, %c0_0] : memref<128x64xbf16, #tpu.memory_space<vmem>>, vector<128x64xbf16>
    %c0_1 = arith.constant 0 : index
    %c0_2 = arith.constant 0 : index
    %1 = vector.load %arg2[%c0_1, %c0_2] : memref<64x128xbf16, #tpu.memory_space<vmem>>, vector<64x128xbf16>
    %cst = arith.constant dense<0.000000e+00> : vector<128x128xf32>
    %2 = tpu.matmul %0, %1, %cst {dimension_numbers = #tpu.dot_dimension_numbers<[1], [0], [0], [1], [0, 0, 1, 1], [], []>} : vector<128x64xbf16>, vector<64x128xbf16>, vector<128x128xf32> -> vector<128x128xf32>
    %3 = arith.truncf %2 : vector<128x128xf32> to vector<128x128xbf16>
    %c0_3 = arith.constant 0 : index
    %c0_4 = arith.constant 0 : index
    %4 = vector.load %arg3[%c0_3, %c0_4] : memref<128x128xbf16, #tpu.memory_space<vmem>>, vector<128x128xbf16>
    tpu.vector_store %arg3[%c0_3, %c0_4], %3 {strides = array<i32>} : memref<128x128xbf16, #tpu.memory_space<vmem>>, vector<128x128xbf16>,
    return
  }
  func.func @transform_0(%arg0: i32) -> (i32, i32) {
    %c0_i32 = arith.constant 0 : i32
    %c0_i32_0 = arith.constant 0 : i32
    return %arg0, %c0_i32 : i32, i32
  }
  func.func @transform_1(%arg0: i32) -> (i32, i32) {
    %c0_i32 = arith.constant 0 : i32
    %c0_i32_0 = arith.constant 0 : i32
    %c0_i32_1 = arith.constant 0 : i32
    return %c0_i32, %c0_i32_0 : i32, i32
  }
  func.func @transform_2(%arg0: i32) -> (i32, i32) {
    %c0_i32 = arith.constant 0 : i32
    %c0_i32_0 = arith.constant 0 : i32
    return %arg0, %c0_i32 : i32, i32
  }
}

module attributes {stable_mosaic.version = 11 : i64} {
  func.func @_agg_kernel(%arg0: i32, %arg1: i32, %arg2: memref<128x128xbf16, #tpu.memory_space<vmem>>, %arg3: memref<128x128xbf16, #tpu.memory_space<vmem>>, %arg4: memref<1x128xf32, #tpu.memory_space<vmem>>, %arg5: memref<128x128xf32, #tpu.memory_space<vmem>>, %arg6: memref<128x128xf32, #tpu.memory_space<vmem>>) attributes {dimension_semantics = [#tpu.dimension_semantics<parallel>, #tpu.dimension_semantics<arbitrary>], iteration_bounds = array<i64: 1, 1>, scalar_prefetch = 0 : i64, scratch_operands = 1 : i64, tpu.core_type = #tpu.core_type<tc>, window_params = [{transform_indices = @transform_0, window_bounds = array<i64: 128, 128>}, {transform_indices = @transform_1, window_bounds = array<i64: 128, 128>}, {pipeline_mode = #tpu.pipeline_mode<synchronous>, transform_indices = @transform_2, window_bounds = array<i64: 1, 128>}, {transform_indices = @transform_3, window_bounds = array<i64: 128, 128>}]} {
    %c0_i32 = arith.constant 0 : i32
    %0 = arith.cmpi eq, %arg1, %c0_i32 : i32
    %1 = arith.extui %0 : i1 to i32
    %c0_i32_0 = arith.constant 0 : i32
    %2 = arith.cmpi ne, %1, %c0_i32_0 : i32
    scf.if %2 {
      %cst_10 = arith.constant 0.000000e+00 : f32
      %12 = vector.broadcast %cst_10 : f32 to vector<128x128xf32>
      %c0_11 = arith.constant 0 : index
      %c0_12 = arith.constant 0 : index
      %13 = vector.load %arg6[%c0_11, %c0_12] : memref<128x128xf32, #tpu.memory_space<vmem>>, vector<128x128xf32>
      tpu.vector_store %arg6[%c0_11, %c0_12], %12 {strides = array<i32>} : memref<128x128xf32, #tpu.memory_space<vmem>>, vector<128x128xf32>,
    } else {
    }
    %c0 = arith.constant 0 : index
    %c0_1 = arith.constant 0 : index
    %3 = vector.load %arg6[%c0, %c0_1] : memref<128x128xf32, #tpu.memory_space<vmem>>, vector<128x128xf32>
    %c0_2 = arith.constant 0 : index
    %c0_3 = arith.constant 0 : index
    %4 = vector.load %arg2[%c0_2, %c0_3] : memref<128x128xbf16, #tpu.memory_space<vmem>>, vector<128x128xbf16>
    %c0_4 = arith.constant 0 : index
    %c0_5 = arith.constant 0 : index
    %5 = vector.load %arg3[%c0_4, %c0_5] : memref<128x128xbf16, #tpu.memory_space<vmem>>, vector<128x128xbf16>
    %cst = arith.constant dense<0.000000e+00> : vector<128x128xf32>
    %6 = tpu.matmul %4, %5, %cst {dimension_numbers = #tpu.dot_dimension_numbers<[1], [0], [0], [1], [0, 0, 1, 1], [], []>} : vector<128x128xbf16>, vector<128x128xbf16>, vector<128x128xf32> -> vector<128x128xf32>
    %7 = arith.addf %3, %6 : vector<128x128xf32>
    %c0_6 = arith.constant 0 : index
    %c0_7 = arith.constant 0 : index
    %8 = vector.load %arg6[%c0_6, %c0_7] : memref<128x128xf32, #tpu.memory_space<vmem>>, vector<128x128xf32>
    tpu.vector_store %arg6[%c0_6, %c0_7], %7 {strides = array<i32>} : memref<128x128xf32, #tpu.memory_space<vmem>>, vector<128x128xf32>,
    %c0_i32_8 = arith.constant 0 : i32
    %9 = arith.cmpi eq, %arg1, %c0_i32_8 : i32
    %10 = arith.extui %9 : i1 to i32
    %c0_i32_9 = arith.constant 0 : i32
    %11 = arith.cmpi ne, %10, %c0_i32_9 : i32
    scf.if %11 {
      %c0_10 = arith.constant 0 : index
      %c0_11 = arith.constant 0 : index
      %12 = vector.load %arg6[%c0_10, %c0_11] : memref<128x128xf32, #tpu.memory_space<vmem>>, vector<128x128xf32>
      %c0_12 = arith.constant 0 : index
      %c0_13 = arith.constant 0 : index
      %13 = vector.load %arg4[%c0_12, %c0_13] : memref<1x128xf32, #tpu.memory_space<vmem>>, vector<1x128xf32>
      %14 = vector.broadcast %13 : vector<1x128xf32> to vector<128x128xf32>
      %15 = arith.addf %12, %14 : vector<128x128xf32>
      %c0_14 = arith.constant 0 : index
      %c0_15 = arith.constant 0 : index
      %16 = vector.load %arg5[%c0_14, %c0_15] : memref<128x128xf32, #tpu.memory_space<vmem>>, vector<128x128xf32>
      tpu.vector_store %arg5[%c0_14, %c0_15], %15 {strides = array<i32>} : memref<128x128xf32, #tpu.memory_space<vmem>>, vector<128x128xf32>,
    } else {
    }
    return
  }
  func.func @transform_0(%arg0: i32, %arg1: i32) -> (i32, i32) {
    %c0_i32 = arith.constant 0 : i32
    return %arg0, %arg1 : i32, i32
  }
  func.func @transform_1(%arg0: i32, %arg1: i32) -> (i32, i32) {
    %c0_i32 = arith.constant 0 : i32
    %c0_i32_0 = arith.constant 0 : i32
    return %arg1, %c0_i32 : i32, i32
  }
  func.func @transform_2(%arg0: i32, %arg1: i32) -> (i32, i32) {
    %c0_i32 = arith.constant 0 : i32
    %c0_i32_0 = arith.constant 0 : i32
    %c0_i32_1 = arith.constant 0 : i32
    return %c0_i32, %c0_i32_0 : i32, i32
  }
  func.func @transform_3(%arg0: i32, %arg1: i32) -> (i32, i32) {
    %c0_i32 = arith.constant 0 : i32
    %c0_i32_0 = arith.constant 0 : i32
    return %arg0, %c0_i32 : i32, i32
  }
}

</mosaic_0001>

<bundles_post_ra>
// kernel: graph_conv.2
= control target key start
LH: loop header
LB: loop body
LE: loop exit
PB: predicated region body
PF: predicated region fallthrough
CT: control target
= control target key end

     0   :  { %vm100_vm0 = vcmask 523264   ;;  %s420_s1 = inlined_call_operand.vmem [shape: bf16[64,128], index: 1, kind: input, shape index: {}]   ;;  %s421_s0 = inlined_call_operand.vmem [shape: bf16[128,64], index: 0, kind: input, shape index: {}]   ;;  %s422_s2 = inlined_call_operand.vmem [shape: bf16[128,128], index: 2, kind: output, shape index: {}]  }
   0x1   :  { %v277_v0 = vld [vmem:[%s420_s1 + $0x18] sm:$0xff]  ;;  %v276_v1 = vld [vmem:[%s420_s1 + $0x10] sm:$0xff]  ;;  %v275_v2 = vld [vmem:[%s420_s1 + $0x8] sm:$0xff] }
   0x2   :  { %129 = vmatpush.bf16.msra.mxu0 %v277_v0  ;;  %325 = vmatpush.bf16.msra.mxu1 %v277_v0  ;;  %v274_v3 = vld [vmem:[%s420_s1] sm:$0xff]  ;;  %v268_v5 = vld [vmem:[%s421_s0 + $0x10] sm:$0xff]  ;;  %v267_v8 = vld [vmem:[%s421_s0 + $0x8] sm:$0xff] }
   0x3   :  { %326 = vmatpush.bf16.msra.mxu2 %v277_v0  ;;  %327 = vmatpush.bf16.msra.mxu3 %v277_v0  ;;  %v266_v4 = vld [vmem:[%s421_s0] sm:$0xff]  ;;  %v272_v7 = vld [vmem:[%s421_s0 + $0x30] sm:$0xff]  ;;  %v269_v9 = vld [vmem:[%s421_s0 + $0x18] sm:$0xff] }
   0x4   :  { %v270_v6 = vld [vmem:[%s421_s0 + $0x20] sm:$0xff]  ;;  %v271_v10 = vld [vmem:[%s421_s0 + $0x28] sm:$0xff]  ;;  %v273_v11 = vld [vmem:[%s421_s0 + $0x38] sm:$0xff] }
   0x6   :  { %130 = vmatpush.bf16.msra.mxu0 %v276_v1  ;;  %328 = vmatpush.bf16.msra.mxu1 %v276_v1 }
   0x7   :  { %329 = vmatpush.bf16.msra.mxu2 %v276_v1  ;;  %330 = vmatpush.bf16.msra.mxu3 %v276_v1 }
   0xa   :  { %131 = vmatpush.bf16.msra.mxu0 %v275_v2  ;;  %331 = vmatpush.bf16.msra.mxu1 %v275_v2 }
   0xb   :  { %332 = vmatpush.bf16.msra.mxu2 %v275_v2  ;;  %333 = vmatpush.bf16.msra.mxu3 %v275_v2 }
   0xe   :  { %132 = vmatpush.bf16.msra.mxu0 %v274_v3  ;;  %334 = vmatpush.bf16.msra.mxu1 %v274_v3 }
   0xf   :  { %335 = vmatpush.bf16.msra.mxu2 %v274_v3  ;;  %336 = vmatpush.bf16.msra.mxu3 %v274_v3 }
  0x11   :  { %258 = vmatmul.msk.bf16.vlgmr.msra.gmra.mxu0 %vm100_vm0, %v266_v4  ;;  %260 = vmatmul.msk.bf16.vlgmr.msra.gmra.mxu1 %vm100_vm0, %v268_v5 }
  0x12   :  { %262 = vmatmul.msk.bf16.vlgmr.msra.gmra.mxu2 %vm100_vm0, %v270_v6  ;;  %264 = vmatmul.msk.bf16.vlgmr.msra.gmra.mxu3 %vm100_vm0, %v272_v7 }
  0x21   :  { %259 = vmatmul.msk.bf16.gmra.mxu0 %vm100_vm0, %v267_v8  ;;  %261 = vmatmul.msk.bf16.gmra.mxu1 %vm100_vm0, %v269_v9 }
  0x22   :  { %263 = vmatmul.msk.bf16.gmra.mxu2 %vm100_vm0, %v271_v10  ;;  %265 = vmatmul.msk.bf16.gmra.mxu3 %vm100_vm0, %v273_v11 }
  0x8e   :  { %v134_v12 = vpop.f32.mrf.mxu0  ;;  %v144_v13 = vpop.f32.mrf.mxu1 }
  0x95   :  { %v154_v14 = vpop.f32.mrf.mxu2  ;;  %v164_v15 = vpop.f32.mrf.mxu3 }
  0x96   :  { %v136_v16 = vpop.f32.mrf.mxu0  ;;  %v146_v17 = vpop.f32.mrf.mxu1 }
  0x97   :  { %v281_v18 = vpack.c.bf16 %v136_v16, %v134_v12  ;;  %v291_v19 = vpack.c.bf16 %v146_v17, %v144_v13 }
  0x99   :  { %282 = vst [vmem:[%s422_s2] sm:$0xff] %v281_v18  }
  0x9a   :  { %319 = vst [vmem:[%s422_s2 + $0x10] sm:$0xff] %v291_v19  }
  0x9d   :  { %v156_v20 = vpop.f32.mrf.mxu2  ;;  %v166_v21 = vpop.f32.mrf.mxu3 }
  0x9e   :  { %v301_v22 = vpack.c.bf16 %v156_v20, %v154_v14  ;;  %v311_v23 = vpack.c.bf16 %v166_v21, %v164_v15  ;;  %v139_v24 = vpop.f32.mrf.mxu0  ;;  %v149_v25 = vpop.f32.mrf.mxu1 }
  0xa0   :  { %321 = vst [vmem:[%s422_s2 + $0x20] sm:$0xff] %v301_v22  }
  0xa1   :  { %323 = vst [vmem:[%s422_s2 + $0x30] sm:$0xff] %v311_v23  }
  0xa5   :  { %v159_v26 = vpop.f32.mrf.mxu2  ;;  %v169_v27 = vpop.f32.mrf.mxu3 }
  0xa6   :  { %v141_v28 = vpop.f32.mrf.mxu0  ;;  %v151_v29 = vpop.f32.mrf.mxu1 }
  0xa7   :  { %v286_v30 = vpack.c.bf16 %v141_v28, %v139_v24  ;;  %v296_v31 = vpack.c.bf16 %v151_v29, %v149_v25 }
  0xa9   :  { %318 = vst [vmem:[%s422_s2 + $0x8] sm:$0xff] %v286_v30  }
  0xaa   :  { %320 = vst [vmem:[%s422_s2 + $0x18] sm:$0xff] %v296_v31  }
  0xad   :  { %v161_v32 = vpop.f32.mrf.mxu2  ;;  %v171_v33 = vpop.f32.mrf.mxu3 }
  0xae   :  { %v306_v34 = vpack.c.bf16 %v161_v32, %v159_v26  ;;  %v316_v35 = vpack.c.bf16 %v171_v33, %v169_v27 }
  0xb0   :  { %322 = vst [vmem:[%s422_s2 + $0x28] sm:$0xff] %v306_v34  }
  0xb1   :  { %324 = vst [vmem:[%s422_s2 + $0x38] sm:$0xff] %v316_v35  }

// kernel: graph_conv.3
= control target key start
LH: loop header
LB: loop body
LE: loop exit
PB: predicated region body
PF: predicated region fallthrough
CT: control target
= control target key end

     0   :  { %s542_s1 = inlined_call_operand.vmem [shape: bf16[128,128], index: 1, kind: input, shape index: {}]   ;;  %s543_s2 = inlined_call_operand.vmem [shape: f32[1,128], index: 2, kind: input, shape index: {}]   ;;  %s544_s0 = inlined_call_operand.vmem [shape: bf16[128,128], index: 0, kind: input, shape index: {}]   ;;  %s545_s3 = inlined_call_operand.vmem [shape: f32[128,128], index: 3, kind: output, shape index: {}]  }
   0x1   :  { %v397_v0 = vld [vmem:[%s542_s1 + $0x38] sm:$0xff]  ;;  %v396_v1 = vld [vmem:[%s542_s1 + $0x30] sm:$0xff]  ;;  %v395_v2 = vld [vmem:[%s542_s1 + $0x28] sm:$0xff] }
   0x2   :  { %178 = vmatpush.bf16.msra.mxu0 %v397_v0  ;;  %398 = vmatpush.bf16.msra.mxu1 %v397_v0  ;;  %v394_v3 = vld [vmem:[%s542_s1 + $0x20] sm:$0xff]  ;;  %v393_v4 = vld [vmem:[%s542_s1 + $0x18] sm:$0xff]  ;;  %v392_v5 = vld [vmem:[%s542_s1 + $0x10] sm:$0xff] }
   0x3   :  { %399 = vmatpush.bf16.msra.mxu2 %v397_v0  ;;  %400 = vmatpush.bf16.msra.mxu3 %v397_v0  ;;  %v391_v6 = vld [vmem:[%s542_s1 + $0x8] sm:$0xff]  ;;  %v390_v7 = vld [vmem:[%s542_s1] sm:$0xff]  ;;  %v384_v9 = vld [vmem:[%s544_s0 + $0x10] sm:$0xff] }
   0x4   :  { %v382_v8 = vld [vmem:[%s544_s0] sm:$0xff]  ;;  %v388_v11 = vld [vmem:[%s544_s0 + $0x30] sm:$0xff]  ;;  %v383_v12 = vld [vmem:[%s544_s0 + $0x8] sm:$0xff] }
   0x5   :  { %v386_v10 = vld [vmem:[%s544_s0 + $0x20] sm:$0xff]  ;;  %v385_v13 = vld [vmem:[%s544_s0 + $0x18] sm:$0xff]  ;;  %v387_v14 = vld [vmem:[%s544_s0 + $0x28] sm:$0xff] }
   0x6   :  { %179 = vmatpush.bf16.msra.mxu0 %v396_v1  ;;  %401 = vmatpush.bf16.msra.mxu1 %v396_v1  ;;  %v389_v15 = vld [vmem:[%s544_s0 + $0x38] sm:$0xff]  ;;  %v422_v16 = vld [vmem:[%s543_s2] ss:$0 sm:$0xff] }
   0x7   :  { %402 = vmatpush.bf16.msra.mxu2 %v396_v1  ;;  %403 = vmatpush.bf16.msra.mxu3 %v396_v1 }
   0xa   :  { %180 = vmatpush.bf16.msra.mxu0 %v395_v2  ;;  %404 = vmatpush.bf16.msra.mxu1 %v395_v2 }
   0xb   :  { %405 = vmatpush.bf16.msra.mxu2 %v395_v2  ;;  %406 = vmatpush.bf16.msra.mxu3 %v395_v2 }
   0xe   :  { %181 = vmatpush.bf16.msra.mxu0 %v394_v3  ;;  %407 = vmatpush.bf16.msra.mxu1 %v394_v3 }
   0xf   :  { %408 = vmatpush.bf16.msra.mxu2 %v394_v3  ;;  %409 = vmatpush.bf16.msra.mxu3 %v394_v3 }
  0x12   :  { %182 = vmatpush.bf16.msra.mxu0 %v393_v4  ;;  %410 = vmatpush.bf16.msra.mxu1 %v393_v4 }
  0x13   :  { %411 = vmatpush.bf16.msra.mxu2 %v393_v4  ;;  %412 = vmatpush.bf16.msra.mxu3 %v393_v4 }
  0x16   :  { %183 = vmatpush.bf16.msra.mxu0 %v392_v5  ;;  %413 = vmatpush.bf16.msra.mxu1 %v392_v5 }
  0x17   :  { %414 = vmatpush.bf16.msra.mxu2 %v392_v5  ;;  %415 = vmatpush.bf16.msra.mxu3 %v392_v5 }
  0x1a   :  { %184 = vmatpush.bf16.msra.mxu0 %v391_v6  ;;  %416 = vmatpush.bf16.msra.mxu1 %v391_v6 }
  0x1b   :  { %417 = vmatpush.bf16.msra.mxu2 %v391_v6  ;;  %418 = vmatpush.bf16.msra.mxu3 %v391_v6 }
  0x1e   :  { %185 = vmatpush.bf16.msra.mxu0 %v390_v7  ;;  %419 = vmatpush.bf16.msra.mxu1 %v390_v7 }
  0x1f   :  { %420 = vmatpush.bf16.msra.mxu2 %v390_v7  ;;  %421 = vmatpush.bf16.msra.mxu3 %v390_v7 }
  0x21   :  { %186 = vmatmul.bf16.vlgmr.msra.gmra.mxu0 %v382_v8  ;;  %196 = vmatmul.bf16.vlgmr.msra.gmra.mxu1 %v384_v9 }
  0x22   :  { %206 = vmatmul.bf16.vlgmr.msra.gmra.mxu2 %v386_v10  ;;  %216 = vmatmul.bf16.vlgmr.msra.gmra.mxu3 %v388_v11 }
  0x31   :  { %191 = vmatmul.bf16.gmra.mxu0 %v383_v12  ;;  %201 = vmatmul.bf16.gmra.mxu1 %v385_v13 }
  0x32   :  { %211 = vmatmul.bf16.gmra.mxu2 %v387_v14  ;;  %221 = vmatmul.bf16.gmra.mxu3 %v389_v15 }
  0x9e   :  { %v187_v17 = vpop.f32.mrf.mxu0  ;;  %v197_v18 = vpop.f32.mrf.mxu1 }
  0x9f   :  { %v282_v19 = vadd.f32 %v422_v16, %v187_v17  ;;  %v286_v20 = vadd.f32 %v422_v16, %v197_v18 }
  0xa1   :  { %298 = vst [vmem:[%s545_s3] sm:$0xff] %v282_v19 }
  0xa2   :  { %302 = vst [vmem:[%s545_s3 + $0x20] sm:$0xff] %v286_v20 }
  0xa5   :  { %v207_v21 = vpop.f32.mrf.mxu2  ;;  %v217_v22 = vpop.f32.mrf.mxu3 }
  0xa6   :  { %v290_v23 = vadd.f32 %v422_v16, %v207_v21  ;;  %v294_v24 = vadd.f32 %v422_v16, %v217_v22  ;;  %v189_v25 = vpop.f32.mrf.mxu0  ;;  %v199_v26 = vpop.f32.mrf.mxu1 }
  0xa7   :  { %v283_v27 = vadd.f32 %v422_v16, %v189_v25  ;;  %v287_v28 = vadd.f32 %v422_v16, %v199_v26 }
  0xa8   :  { %306 = vst [vmem:[%s545_s3 + $0x40] sm:$0xff] %v290_v23 }
  0xa9   :  { %310 = vst [vmem:[%s545_s3 + $0x60] sm:$0xff] %v294_v24 }
  0xaa   :  { %299 = vst [vmem:[%s545_s3 + $0x8] sm:$0xff] %v283_v27 }
  0xab   :  { %303 = vst [vmem:[%s545_s3 + $0x28] sm:$0xff] %v287_v28 }
  0xad   :  { %v209_v29 = vpop.f32.mrf.mxu2  ;;  %v219_v30 = vpop.f32.mrf.mxu3 }
  0xae   :  { %v291_v31 = vadd.f32 %v422_v16, %v209_v29  ;;  %v295_v32 = vadd.f32 %v422_v16, %v219_v30  ;;  %v192_v33 = vpop.f32.mrf.mxu0  ;;  %v202_v34 = vpop.f32.mrf.mxu1 }
  0xaf   :  { %v284_v35 = vadd.f32 %v422_v16, %v192_v33  ;;  %v288_v36 = vadd.f32 %v422_v16, %v202_v34 }
  0xb0   :  { %307 = vst [vmem:[%s545_s3 + $0x48] sm:$0xff] %v291_v31 }
  0xb1   :  { %311 = vst [vmem:[%s545_s3 + $0x68] sm:$0xff] %v295_v32 }
  0xb2   :  { %300 = vst [vmem:[%s545_s3 + $0x10] sm:$0xff] %v284_v35 }
  0xb3   :  { %304 = vst [vmem:[%s545_s3 + $0x30] sm:$0xff] %v288_v36 }
  0xb5   :  { %v212_v37 = vpop.f32.mrf.mxu2  ;;  %v222_v38 = vpop.f32.mrf.mxu3 }
  0xb6   :  { %v292_v39 = vadd.f32 %v422_v16, %v212_v37  ;;  %v296_v40 = vadd.f32 %v422_v16, %v222_v38  ;;  %v194_v41 = vpop.f32.mrf.mxu0  ;;  %v204_v42 = vpop.f32.mrf.mxu1 }
  0xb7   :  { %v285_v43 = vadd.f32 %v422_v16, %v194_v41  ;;  %v289_v44 = vadd.f32 %v422_v16, %v204_v42 }
  0xb8   :  { %308 = vst [vmem:[%s545_s3 + $0x50] sm:$0xff] %v292_v39 }
  0xb9   :  { %312 = vst [vmem:[%s545_s3 + $0x70] sm:$0xff] %v296_v40 }
  0xba   :  { %301 = vst [vmem:[%s545_s3 + $0x18] sm:$0xff] %v285_v43 }
  0xbb   :  { %305 = vst [vmem:[%s545_s3 + $0x38] sm:$0xff] %v289_v44 }
  0xbd   :  { %v214_v45 = vpop.f32.mrf.mxu2  ;;  %v224_v46 = vpop.f32.mrf.mxu3 }
  0xbe   :  { %v293_v47 = vadd.f32 %v422_v16, %v214_v45  ;;  %v297_v48 = vadd.f32 %v422_v16, %v224_v46 }
  0xc0   :  { %309 = vst [vmem:[%s545_s3 + $0x58] sm:$0xff] %v293_v47 }
  0xc1   :  { %313 = vst [vmem:[%s545_s3 + $0x78] sm:$0xff] %v297_v48 }

</bundles_post_ra>
